<compile_context>
chip_gen: v6e
topology: v6e:2x2x1
jax: 0.10.0
libtpu: 0.0.40
codegen_flags: <defaults>
</compile_context>

<pallas_src>
import functools

import jax
import jax.numpy as jnp
from jax import lax
from jax.experimental import pallas as pl
from jax.experimental.pallas import tpu as pltpu


def _round_up(x: int, m: int) -> int:
    return ((x + m - 1) // m) * m


def _vmem_capacity_bytes() -> int:
    """Physical VMEM per TensorCore; conservative (v7x, 64 MiB) fallback."""
    try:
        cap = int(pltpu.get_tpu_info().vmem_capacity_bytes)
        if cap > 0:
            return cap
    except Exception:
        pass
    return 64 * 1024 * 1024


def _arithmetic_kernel(x_row_ref, x_col_ref, o_ref, *, eps: float, strip: int):
    # x_row_ref : (TB, 1, N)    feature rows, lane-dense ("j" operand)
    # x_col_ref : (TB, TN, 1)   column slice of the same rows ("i" operand, sublanes)
    # o_ref     : (TB, 4, TN, N)  channels = [mul, div, add, sub]
    tb, _, tn, n = o_ref.shape

    row = jnp.reshape(x_row_ref[...], (tb, 1, 1, n))      # x_j along lanes
    inv_row = 1.0 / (row + eps)                           # O(N) divides per grid step

    def emit_strip(off, size):
        col = jnp.reshape(x_col_ref[:, pl.ds(off, size), :], (tb, 1, size, 1))
        o_ref[:, 0:1, pl.ds(off, size), :] = col * row         # multiplied: x_i * x_j
        o_ref[:, 1:2, pl.ds(off, size), :] = col * inv_row     # divided:   x_i / (x_j + eps)
        o_ref[:, 2:3, pl.ds(off, size), :] = col + row         # added
        o_ref[:, 3:4, pl.ds(off, size), :] = col - row         # subtracted

    n_full = tn // strip
    rem = tn - n_full * strip

    if n_full > 0:
        def body(s, carry):
            emit_strip(pl.multiple_of(s * strip, strip), strip)
            return carry
        # Short trip counts are unrolled so the LLO scheduler sees the whole loop.
        lax.fori_loop(0, n_full, body, 0, unroll=(n_full <= 8))
    if rem > 0:
        emit_strip(n_full * strip, rem)        # static tail strip (tn not multiple of strip)


def _choose_tiles(B: int, N: int, itemsize: int, budget: int, strip: int):
    """Pick (tb, tn) for a cdiv grid: largest aligned tiles whose per-step
    footprint (with (8,128) VMEM tile padding) fits `budget`, capped so the
    per-strip live set stays far under the 64-vreg file, and adjusted so the
    grid has >= 2 steps whenever possible (v7x megacore)."""
    n_lane = _round_up(N, 128)

    def row_slab_bytes(tn):
        # One batch row's (4, tn, N) output block, VMEM-padded.
        return 4 * _round_up(tn, 8) * n_lane * itemsize

    if row_slab_bytes(N) <= budget:
        tn = N
    else:
        tn = (budget // (4 * n_lane * itemsize)) // strip * strip
        tn = max(strip, min(tn, N))

    def step_bytes(tb):
        out_b = tb * row_slab_bytes(tn)
        in_row = tb * 8 * n_lane * itemsize                 # (tb,1,N) padded
        in_col = tb * _round_up(tn, 8) * 128 * itemsize     # (tb,tn,1) padded
        return out_b + in_row + in_col

    tb_budget = max(1, budget // max(1, step_bytes(1)))
    # vreg pressure: one strip slab is tb*strip*N elems; keep it <= ~16 vregs (64 KiB).
    tb_vreg = max(1, (64 * 1024) // max(1, strip * N * itemsize))
    tb = max(1, min(B, tb_budget, tb_vreg))

    def cdiv(a, b):
        return -(-a // b)

    # Megacore: ensure at least 2 grid steps so v7x's second TensorCore has work.
    if cdiv(B, tb) * cdiv(N, tn) < 2:
        if B >= 2:
            tb = cdiv(B, 2)
        elif N > strip:
            tn = min(N, max(strip, _round_up(cdiv(N, 2), strip)))

    return tb, tn, step_bytes(tb)


def arithmetic_layer(x: jax.Array, epsilon: float = 1e-4) -> jax.Array:
    """Pallas implementation of ArithmeticLayer.forward for x of shape (B, N)."""
    if x.ndim != 2:
        raise ValueError("arithmetic_layer expects a 2-D input (batch, features)")
    B, N = x.shape
    itemsize = jnp.dtype(x.dtype).itemsize
    strip = 8 * max(1, 4 // itemsize)          # native sublane tile: 8 f32 / 16 bf16

    cap = _vmem_capacity_bytes()
    # Generation-aware per-step budget: tighter on 64 MiB VMEM parts (v7x),
    # larger on 128 MiB parts (v5e/v6e) so DMA time dwarfs the ~0.35us step cost.
    budget = (6 << 20) if cap <= (64 << 20) else (12 << 20)

    tb, tn, per_step = _choose_tiles(B, N, itemsize, budget, strip)
    grid = (pl.cdiv(B, tb), pl.cdiv(N, tn))

    # Double-buffered in/out blocks + margin, always clamped below physical VMEM.
    vmem_limit = int(max(16 << 20,
                         min(cap - (8 << 20),
                             max(32 << 20, 2 * per_step + (8 << 20)))))

    # Two free views of the same contiguous data: lane-dense row operand and
    # sublane-major column operand (no in-kernel transpose needed).
    x_row = x.reshape(B, 1, N)
    x_col = x.reshape(B, N, 1)

    kernel = functools.partial(_arithmetic_kernel, eps=float(epsilon), strip=strip)

    cost = pl.CostEstimate(
        flops=4 * B * N * N + B * N,
        transcendentals=0,
        bytes_accessed=(4 * B * N * N + 2 * B * N) * itemsize,
    )

    return pl.pallas_call(
        kernel,
        out_shape=jax.ShapeDtypeStruct((B, 4, N, N), x.dtype),
        grid_spec=pltpu.PrefetchScalarGridSpec(
            num_scalar_prefetch=0,
            grid=grid,
            in_specs=[
                pl.BlockSpec((tb, 1, N), lambda i, j: (i, 0, 0)),    # full rows
                pl.BlockSpec((tb, tn, 1), lambda i, j: (i, j, 0)),   # column slice
            ],
            out_specs=pl.BlockSpec((tb, 4, tn, N), lambda i, j: (i, 0, j, 0)),
        ),
        compiler_params=pltpu.CompilerParams(
            dimension_semantics=("parallel", "parallel"),   # megacore-friendly
            vmem_limit_bytes=vmem_limit,
        ),
        cost_estimate=cost,
    )(x_row, x_col)


def _reference(x: jax.Array, epsilon: float = 1e-4) -> jax.Array:
    xi = x[..., :, None]
    xj = x[..., None, :]
    return jnp.stack([xi * xj, xi / (xj + epsilon), xi + xj, xi - xj], axis=1)


if __name__ == "__main__":
    key = jax.random.PRNGKey(0)
    B, N = 2, 16
    x = jax.random.normal(key, (B, N), dtype=jnp.float32)

    out = arithmetic_layer(x, epsilon=1e-4)
    out = jax.block_until_ready(out)

    ref = _reference(x, epsilon=1e-4)
    assert out.shape == (B, 4, N, N)
    assert jnp.allclose(out, ref, rtol=1e-5, atol=1e-5), "mismatch vs reference"

    print("KERNEL_OK")
</pallas_src>

<mosaic_0001>
module attributes {stable_mosaic.version = 11 : i64} {
  func.func @_arithmetic_kernel(%arg0: i32, %arg1: i32, %arg2: memref<1x1x16xf32, #tpu.memory_space<vmem>>, %arg3: memref<1x16x1xf32, #tpu.memory_space<vmem>>, %arg4: memref<1x4x16x16xf32, #tpu.memory_space<vmem>>) attributes {dimension_semantics = [#tpu.dimension_semantics<parallel>, #tpu.dimension_semantics<parallel>], iteration_bounds = array<i64: 2, 1>, scalar_prefetch = 0 : i64, scratch_operands = 0 : i64, tpu.core_type = #tpu.core_type<tc>, window_params = [{transform_indices = @transform_0, window_bounds = array<i64: 1, 1, 16>}, {transform_indices = @transform_1, window_bounds = array<i64: 1, 16, 1>}, {transform_indices = @transform_2, window_bounds = array<i64: 1, 4, 16, 16>}]} {
    %c0 = arith.constant 0 : index
    %c0_0 = arith.constant 0 : index
    %c0_1 = arith.constant 0 : index
    %0 = vector.load %arg2[%c0, %c0_0, %c0_1] : memref<1x1x16xf32, #tpu.memory_space<vmem>>, vector<1x1x16xf32>
    %1 = vector.shape_cast %0 : vector<1x1x16xf32> to vector<1x1x1x16xf32>
    %cst = arith.constant 9.99999974E-5 : f32
    %2 = vector.broadcast %cst : f32 to vector<1x1x1x16xf32>
    %3 = arith.addf %1, %2 : vector<1x1x1x16xf32>
    %cst_2 = arith.constant 1.000000e+00 : f32
    %4 = vector.broadcast %cst_2 : f32 to vector<1x1x1x16xf32>
    %5 = arith.divf %4, %3 : vector<1x1x1x16xf32>
    %c0_i32 = arith.constant 0 : i32
    %c8_i32 = arith.constant 8 : i32
    %6 = arith.muli %c0_i32, %c8_i32 : i32
    %7 = tpu.assume_multiple %6, 8 : i32
    %c0_3 = arith.constant 0 : index
    %8 = arith.index_cast %7 : i32 to index
    %c0_4 = arith.constant 0 : index
    %9 = vector.load %arg3[%c0_3, %8, %c0_4] : memref<1x16x1xf32, #tpu.memory_space<vmem>>, vector<1x8x1xf32>
    %10 = vector.shape_cast %9 : vector<1x8x1xf32> to vector<1x1x8x1xf32>
    %11 = vector.broadcast %10 : vector<1x1x8x1xf32> to vector<1x1x8x16xf32>
    %12 = vector.broadcast %1 : vector<1x1x1x16xf32> to vector<1x1x8x16xf32>
    %13 = arith.mulf %11, %12 : vector<1x1x8x16xf32>
    %c0_5 = arith.constant 0 : index
    %c0_6 = arith.constant 0 : index
    %14 = arith.index_cast %7 : i32 to index
    %c0_7 = arith.constant 0 : index
    %15 = vector.load %arg4[%c0_5, %c0_6, %14, %c0_7] : memref<1x4x16x16xf32, #tpu.memory_space<vmem>>, vector<1x1x8x16xf32>
    tpu.vector_store %arg4[%c0_5, %c0_6, %14, %c0_7], %13 {strides = array<i32>} : memref<1x4x16x16xf32, #tpu.memory_space<vmem>>, vector<1x1x8x16xf32>,
    %16 = vector.broadcast %10 : vector<1x1x8x1xf32> to vector<1x1x8x16xf32>
    %17 = vector.broadcast %5 : vector<1x1x1x16xf32> to vector<1x1x8x16xf32>
    %18 = arith.mulf %16, %17 : vector<1x1x8x16xf32>
    %c0_8 = arith.constant 0 : index
    %c1 = arith.constant 1 : index
    %19 = arith.index_cast %7 : i32 to index
    %c0_9 = arith.constant 0 : index
    %20 = vector.load %arg4[%c0_8, %c1, %19, %c0_9] : memref<1x4x16x16xf32, #tpu.memory_space<vmem>>, vector<1x1x8x16xf32>
    tpu.vector_store %arg4[%c0_8, %c1, %19, %c0_9], %18 {strides = array<i32>} : memref<1x4x16x16xf32, #tpu.memory_space<vmem>>, vector<1x1x8x16xf32>,
    %21 = vector.broadcast %10 : vector<1x1x8x1xf32> to vector<1x1x8x16xf32>
    %22 = vector.broadcast %1 : vector<1x1x1x16xf32> to vector<1x1x8x16xf32>
    %23 = arith.addf %21, %22 : vector<1x1x8x16xf32>
    %c0_10 = arith.constant 0 : index
    %c2 = arith.constant 2 : index
    %24 = arith.index_cast %7 : i32 to index
    %c0_11 = arith.constant 0 : index
    %25 = vector.load %arg4[%c0_10, %c2, %24, %c0_11] : memref<1x4x16x16xf32, #tpu.memory_space<vmem>>, vector<1x1x8x16xf32>
    tpu.vector_store %arg4[%c0_10, %c2, %24, %c0_11], %23 {strides = array<i32>} : memref<1x4x16x16xf32, #tpu.memory_space<vmem>>, vector<1x1x8x16xf32>,
    %26 = vector.broadcast %10 : vector<1x1x8x1xf32> to vector<1x1x8x16xf32>
    %27 = vector.broadcast %1 : vector<1x1x1x16xf32> to vector<1x1x8x16xf32>
    %28 = arith.subf %26, %27 : vector<1x1x8x16xf32>
    %c0_12 = arith.constant 0 : index
    %c3 = arith.constant 3 : index
    %29 = arith.index_cast %7 : i32 to index
    %c0_13 = arith.constant 0 : index
    %30 = vector.load %arg4[%c0_12, %c3, %29, %c0_13] : memref<1x4x16x16xf32, #tpu.memory_space<vmem>>, vector<1x1x8x16xf32>
    tpu.vector_store %arg4[%c0_12, %c3, %29, %c0_13], %28 {strides = array<i32>} : memref<1x4x16x16xf32, #tpu.memory_space<vmem>>, vector<1x1x8x16xf32>,
    %c1_i32 = arith.constant 1 : i32
    %c8_i32_14 = arith.constant 8 : i32
    %31 = arith.muli %c1_i32, %c8_i32_14 : i32
    %32 = tpu.assume_multiple %31, 8 : i32
    %c0_15 = arith.constant 0 : index
    %33 = arith.index_cast %32 : i32 to index
    %c0_16 = arith.constant 0 : index
    %34 = vector.load %arg3[%c0_15, %33, %c0_16] : memref<1x16x1xf32, #tpu.memory_space<vmem>>, vector<1x8x1xf32>
    %35 = vector.shape_cast %34 : vector<1x8x1xf32> to vector<1x1x8x1xf32>
    %36 = vector.broadcast %35 : vector<1x1x8x1xf32> to vector<1x1x8x16xf32>
    %37 = vector.broadcast %1 : vector<1x1x1x16xf32> to vector<1x1x8x16xf32>
    %38 = arith.mulf %36, %37 : vector<1x1x8x16xf32>
    %c0_17 = arith.constant 0 : index
    %c0_18 = arith.constant 0 : index
    %39 = arith.index_cast %32 : i32 to index
    %c0_19 = arith.constant 0 : index
    %40 = vector.load %arg4[%c0_17, %c0_18, %39, %c0_19] : memref<1x4x16x16xf32, #tpu.memory_space<vmem>>, vector<1x1x8x16xf32>
    tpu.vector_store %arg4[%c0_17, %c0_18, %39, %c0_19], %38 {strides = array<i32>} : memref<1x4x16x16xf32, #tpu.memory_space<vmem>>, vector<1x1x8x16xf32>,
    %41 = vector.broadcast %35 : vector<1x1x8x1xf32> to vector<1x1x8x16xf32>
    %42 = vector.broadcast %5 : vector<1x1x1x16xf32> to vector<1x1x8x16xf32>
    %43 = arith.mulf %41, %42 : vector<1x1x8x16xf32>
    %c0_20 = arith.constant 0 : index
    %c1_21 = arith.constant 1 : index
    %44 = arith.index_cast %32 : i32 to index
    %c0_22 = arith.constant 0 : index
    %45 = vector.load %arg4[%c0_20, %c1_21, %44, %c0_22] : memref<1x4x16x16xf32, #tpu.memory_space<vmem>>, vector<1x1x8x16xf32>
    tpu.vector_store %arg4[%c0_20, %c1_21, %44, %c0_22], %43 {strides = array<i32>} : memref<1x4x16x16xf32, #tpu.memory_space<vmem>>, vector<1x1x8x16xf32>,
    %46 = vector.broadcast %35 : vector<1x1x8x1xf32> to vector<1x1x8x16xf32>
    %47 = vector.broadcast %1 : vector<1x1x1x16xf32> to vector<1x1x8x16xf32>
    %48 = arith.addf %46, %47 : vector<1x1x8x16xf32>
    %c0_23 = arith.constant 0 : index
    %c2_24 = arith.constant 2 : index
    %49 = arith.index_cast %32 : i32 to index
    %c0_25 = arith.constant 0 : index
    %50 = vector.load %arg4[%c0_23, %c2_24, %49, %c0_25] : memref<1x4x16x16xf32, #tpu.memory_space<vmem>>, vector<1x1x8x16xf32>
    tpu.vector_store %arg4[%c0_23, %c2_24, %49, %c0_25], %48 {strides = array<i32>} : memref<1x4x16x16xf32, #tpu.memory_space<vmem>>, vector<1x1x8x16xf32>,
    %51 = vector.broadcast %35 : vector<1x1x8x1xf32> to vector<1x1x8x16xf32>
    %52 = vector.broadcast %1 : vector<1x1x1x16xf32> to vector<1x1x8x16xf32>
    %53 = arith.subf %51, %52 : vector<1x1x8x16xf32>
    %c0_26 = arith.constant 0 : index
    %c3_27 = arith.constant 3 : index
    %54 = arith.index_cast %32 : i32 to index
    %c0_28 = arith.constant 0 : index
    %55 = vector.load %arg4[%c0_26, %c3_27, %54, %c0_28] : memref<1x4x16x16xf32, #tpu.memory_space<vmem>>, vector<1x1x8x16xf32>
    tpu.vector_store %arg4[%c0_26, %c3_27, %54, %c0_28], %53 {strides = array<i32>} : memref<1x4x16x16xf32, #tpu.memory_space<vmem>>, vector<1x1x8x16xf32>,
    %c2_i32 = arith.constant 2 : i32
    return
  }
  func.func @transform_0(%arg0: i32, %arg1: i32) -> (i32, i32, i32) {
    %c0_i32 = arith.constant 0 : i32
    %c0_i32_0 = arith.constant 0 : i32
    %c0_i32_1 = arith.constant 0 : i32
    return %arg0, %c0_i32, %c0_i32_0 : i32, i32, i32
  }
  func.func @transform_1(%arg0: i32, %arg1: i32) -> (i32, i32, i32) {
    %c0_i32 = arith.constant 0 : i32
    %c0_i32_0 = arith.constant 0 : i32
    return %arg0, %arg1, %c0_i32 : i32, i32, i32
  }
  func.func @transform_2(%arg0: i32, %arg1: i32) -> (i32, i32, i32, i32) {
    %c0_i32 = arith.constant 0 : i32
    %c0_i32_0 = arith.constant 0 : i32
    %c0_i32_1 = arith.constant 0 : i32
    return %arg0, %c0_i32, %arg1, %c0_i32_0 : i32, i32, i32, i32
  }
}

</mosaic_0001>

<bundles_post_ra>
// kernel: tpu_custom_call.1
= control target key start
LH: loop header
LB: loop body
LE: loop exit
PB: predicated region body
PF: predicated region fallthrough
CT: control target
= control target key end

     0   :  { %7 = vsyncpa [#allocation3], 0  ;;  %s662_s0 = inlined_call_operand.vmem [shape: f32[2,1,16], index: 0, kind: input, shape index: {}]   ;;  %s663_s1 = inlined_call_operand.vmem [shape: f32[2,16,1], index: 1, kind: input, shape index: {}]   ;;  %s664_s2 = inlined_call_operand.hbm [shape: f32[2,4,16,16], index: 2, kind: output, shape index: {}]  }
   0x1   :  { %9 = vsyncpa [#allocation3 + $0x1], 0  ;;  %s537_s9 = smov 0   ;;  %s539_s10 = smov 0  }
   0x2   :  { %s541_s11 = smov 0   ;;  %s543_s12 = smov 0  }
   0x3   :  { %s545_s13 = smov 0   ;;  %s547_s14 = smov 0  }
   0x4 LB: > { %s356_s15 = sadd.s32 4294967295, %s516_s14   ;;  %s357_s16 = sadd.s32 4294967294, %s516_s14   ;;  %s516_s14 = sphi %s547_s14, %s15_s14   ;;  %s512_s13 = sphi %s545_s13, %s671_s13   ;;  %s508_s12 = sphi %s543_s12, %s670_s12   ;;  %s504_s11 = sphi %s541_s11, %s669_s11   ;;  %s500_s10 = sphi %s539_s10, %s668_s10   ;;  %s496_s9 = sphi %s537_s9, %s667_s9  }
   0x5   : > { %s27_s17 = sadd.s32 1, %s512_s13  ;;  %s90_s18 = sadd.s32 1, %s504_s11 }
   0x6   : > { %p29_p0 = scmp.ge.s32.totalorder %s27_s17, 2  ;;  %p100_p1 = scmp.ne.s32.totalorder %s504_s11, %s500_s10 }
   0x7   : > { %p101_p2 = scmp.eq.s32.totalorder %s356_s15, 1  ;;  %p106_p3 = scmp.ne.s32.totalorder %s500_s10, %s496_s9 }
   0x8   : > { %s673_s17 = smov (%p29_p0, %s27_s17), 0  ;;  %p107_p5 = scmp.eq.s32.totalorder %s357_s16, 1 }
   0x9   : > { %p577_p4 = por %p101_p2, %p100_p1  ;;  %s85_s20 = ssub.s32 %s512_s13, %s673_s17 }
   0xa   : > { %p360_p6 = scmp.ge.s32.totalorder %s516_s14, 1  ;;  %p88_p7 = scmp.eq.s32.totalorder %s85_s20, 0 }
   0xb   : > { %p584_p8 = por %p107_p5, %p106_p3  ;;  %p144_p9 = scmp.lt.s32.totalorder %s516_s14, 3 }
   0xc   : > { %s590_s22 = scalar_select %p88_p7, %s504_s11, %s90_s18  }
   0xd   : > { %p145_p10 = pnand %p360_p6, %p144_p9 }
   0xe   : > { %p173_p11 = scmp.lt.s32.totalorder (!%p145_p10), %s508_s12, 1  ;;  %s170_s3 = sand.u32 (!%p145_p10), 1, %s500_s10  }
   0xf   : > { %148 = sbr.rel (%p145_p10) target bundleno = 170 (0xaa), region = 28  ;;  %s361_s4 = sshll.u32 (!%p145_p10), %s170_s3, 6 }
  0x10   : > { %s378_s5 = sshll.u32 (!%p145_p10), %s508_s12, 10  ;;  %s172_s6 = scalar_lea.vmem (!%p145_p10), [#allocation2], %s361_s4 }
  0x11   : > { %s262_s7 = sshll.u32 (!%p145_p10), %s172_s6, 4  ;;  %s609_s16 = scalar_lea.hbm (!%p145_p10), %s664_s2, %s378_s5  ;;  %s611_s7 = int_to_ptr.vmem [resolvable:$true] %s262_s7 }
  0x12   : > { %s440_s18 = scalar_lea.vmem (!%p145_p10), %s611_s7, 1024  ;;  %s519_s20 = smov (!%p145_p10), [#allocation2]  }
  0x13   : > { %p441_p12 = scmp.ne.s32.totalorder (!%p145_p10), %s611_s7, %s440_s18 }
  0x14   : > { %v518_v0 = vmov 0   ;;  %s174_s23 = scalar_select %p173_p11, %s508_s12, 1  ;;  %v198_v5 = vlaneseq  ;;  %vm204_vm0 = vcmask 130048  }
  0x15   : > { %437 = vset.pattern.permute.xlu0 %v518_v0  ;;  %s617_s12 = scalar_lea.sflag [#allocation3], %s170_s3  ;;  %p442_p13 = pnand %p441_p12, %p577_p4 }
  0x16   : > { %s377_s24 = sshll.u32 %s174_s23, 4  ;;  %s175_s30 = scalar_lea.vmem %s662_s0, %s174_s23  ;;  %v199_v6 = vshrl.u32 %v198_v5, 7 }
  0x17   : > { %s184_s27 = scalar_lea.vmem %s663_s1, %s377_s24  ;;  %v187_v3 = vld [vmem:[%s175_s30] sm:$0x1]  ;;  %p443_p0 = pneg %p442_p13 }
  0x18   : > { %v191_v1 = vld [vmem:[%s184_s27] sm:$0xff]  ;;  %v367_v2 = vld [vmem:[%s184_s27 + $0x8] sm:$0xff]  ;;  %v188_v4 = vadd.f32 0.0001, %v187_v3  ;;  %v200_v7 = vsub.s32 0, %v199_v6  ;;  %s444_s23 = sshll.u32 %s519_s20, 4  ;;  %s445_s23 = int_to_ptr.vmem [resolvable:$false] %s444_s23 }
  0x19   : > { %194 = vperm.xlu0 %437, %v191_v1   ;;  %s446_s24 = scalar_lea.vmem %s445_s23, 2048  ;;  %p447_p1 = scmp.lt.s32.totalorder %s611_s7, %s445_s23 }
  0x1a   : > { %438 = vrcp.f32 %v188_v4  ;;  %v201_v9 = vrot.slane %v187_v3, %v200_v7  ;;  %p448_p2 = scmp.lt.s32.totalorder %s446_s24, %s440_s18 }
  0x1c   : > { %p449_p3 = por %p448_p2, %p447_p1 }
  0x1d   : > { %228 = vperm.xlu0 %437, %v367_v2  }
  0x1e   : > { %p450_p5 = pnand %p449_p3, %p443_p0 }
  0x27   : > { %v439_v8 = vpop.eup %438 }
  0x28   : > { %v210_v10 = vrot.slane %v439_v8, %v200_v7 }
  0x94   : > { %v195_v11 = vpop.permute.xlu0 %194 }
  0x95   : > { %v203_v12 = vmul.f32 %v201_v9, %v195_v11  ;;  %v216_v13 = vadd.f32 %v201_v9, %v195_v11  ;;  %v220_v14 = vsub.f32 %v195_v11, %v201_v9  ;;  %v212_v15 = vmul.f32 %v210_v10, %v195_v11 }
  0x97   : > { %205 = vst.msk [vmem:[%s172_s6] sm:$0xff] %vm204_vm0, %v203_v12  ;;  %365 = vst.msk [vmem:[%s172_s6 + $0x20] sm:$0xff] %vm204_vm0, %v216_v13 }
  0x98   : > { %366 = vst.msk [vmem:[%s172_s6 + $0x30] sm:$0xff] %vm204_vm0, %v220_v14  ;;  %364 = vst.msk [vmem:[%s172_s6 + $0x10] sm:$0xff] %vm204_vm0, %v212_v15  ;;  %v229_v16 = vpop.permute.xlu0 %228 }
  0x99   : > { %v231_v17 = vmul.f32 %v229_v16, %v201_v9  ;;  %v234_v18 = vmul.f32 %v229_v16, %v210_v10  ;;  %v238_v19 = vadd.f32 %v229_v16, %v201_v9  ;;  %v242_v20 = vsub.f32 %v229_v16, %v201_v9 }
  0x9b   : > { %368 = vst.msk [vmem:[%s172_s6 + $0x8] sm:$0xff] %vm204_vm0, %v231_v17  ;;  %369 = vst.msk [vmem:[%s172_s6 + $0x18] sm:$0xff] %vm204_vm0, %v234_v18 }
  0x9c   : > { %370 = vst.msk [vmem:[%s172_s6 + $0x28] sm:$0xff] %vm204_vm0, %v238_v19  ;;  %371 = vst.msk [vmem:[%s172_s6 + $0x38] sm:$0xff] %vm204_vm0, %v242_v20 }
  0x9d   : > { %453 = shalt.err (!%p450_p5)
}
  0x9e   : > { %s454_s25 = scalar_lea.hbm %s609_s16, 1024  ;;  %s458_s28 = scalar_lea.hbm %s664_s2, 2048 }
  0x9f   : > { %p455_p6 = scmp.ne.s32.totalorder %s609_s16, %s454_s25  ;;  %p459_p10 = scmp.lt.s32.totalorder %s609_s16, %s664_s2 }
  0xa0   : > { %p460_p11 = scmp.lt.s32.totalorder %s458_s28, %s454_s25 }
  0xa1   : > { %p456_p7 = pnand %p455_p6, %p577_p4 }
  0xa2   : > { %p461_p12 = por %p460_p11, %p459_p10 }
  0xa3   : > { %p457_p9 = pneg %p456_p7 }
  0xa5   : > { %p462_p13 = pnand %p461_p12, %p457_p9 }
  0xa7   : > { %465 = shalt.err (!%p462_p13)
}
  0xa8   : > { %s520_s3 = smov 128   ;;  %s521_s4 = smov 8  }
  0xa9   : > { %379 = dma.vmem_to_hbm [thread:$0]  (%p577_p4), %s611_s7, 1024, %s609_s16, %s617_s12, %s520_s3, %s520_s3, %s521_s4  }
  0xaa PF: > { %p385_p0 = scmp.ge.s32.totalorder %s516_s14, 2  ;;  %s277_s5 = sand.u32 1, %s496_s9  }
  0xab   : > { %s278_s6 = scalar_lea.sflag [#allocation3], %s277_s5 }
  0xac   : > { %p382_p1 = pnand %p385_p0, %p584_p8 }
  0xae   : > { %p383_p2 = pneg %p382_p1 }
  0xb0   : > { %491 = dma.done.wait (%p383_p2), %s278_s6, 1024  }
  0xb1   : > { %493 = vsyncadd (%p383_p2), %s278_s6, 4294966272  ;;  %s15_s14 = sadd.s32 1, %s516_s14   ;;  %s667_s9 = smov %s500_s10 }
  0xb2   : > { %p12_p3 = scmp.ge.s32.totalorder %s15_s14, 4   ;;  %s668_s10 = smov %s504_s11 }
  0xb3   : > { %s669_s11 = smov %s590_s22  ;;  %s670_s12 = smov %s512_s13 }
  0xb4   : > { %s671_s13 = smov %s673_s17  ;;  %14 = sbr.rel (!%p12_p3) target bundleno = 4 (0x4), region = 74 }
  0xb9   :  { %283 = vsyncpa [#allocation3], 1 }
  0xba   :  { %285 = vsyncpa [#allocation3 + $0x1], 1 }

</bundles_post_ra>
